<compile_context>
chip_gen: v6e
topology: v6e:2x2x1
jax: 0.10.0
libtpu: 0.0.40
codegen_flags: <defaults>
</compile_context>

<pallas_src>
import functools

import jax
import jax.numpy as jnp
from jax.experimental import pallas as pl
from jax.experimental.pallas import tpu as pltpu

LEAKY_SLOPE = 0.01  # nn.LeakyReLU default negative_slope

C_IN, C_MID, C_OUT = 3, 16, 3


def _generator_kernel(x_ref, masks_ref, w1_ref, b1_ref, w2_ref, b2_ref, o_ref, *, W):
    # x_ref    : (3, L)            channel-major lane stream, L = nb*H*W
    # masks_ref: (9, L)            1.0 where tap t reads inside its own image
    # w1_ref   : (9, 16, 3)        conv1 per-tap weights
    # b1_ref   : (16, 1)
    # w2_ref   : (9, 3, 16)        conv2 per-tap weights
    # b2_ref   : (3, 1)
    # o_ref    : (3, L)
    L = x_ref.shape[-1]

    masks = masks_ref[...]
    tap_masks = [masks[t:t + 1, :] for t in range(9)]     # (1, L) each, hoisted

    def conv3x3(act, w_ref, b_ref):
        # act: (C_in, L) -> (C_out, L) f32.  9 accumulating dots, taps in vregs.
        # Center tap (dy=dx=0): no roll, no mask.
        acc = jnp.dot(w_ref[4], act, preferred_element_type=jnp.float32)
        for t in range(9):
            if t == 4:
                continue
            s = (t // 3 - 1) * W + (t % 3 - 1)             # flat lane shift of tap t
            # Roll wraps (across images / block edge) land only on positions the
            # border mask zeroes, so the flattened roll is exact for 3x3, pad=1.
            tap = pltpu.roll(act, shift=(-s) % L, axis=1) * tap_masks[t]
            acc = acc + jnp.dot(w_ref[t], tap, preferred_element_type=jnp.float32)
        return acc + b_ref[...]

    y1 = conv3x3(x_ref[...], w1_ref, b1_ref)               # (16, L)
    y1 = jnp.maximum(y1, LEAKY_SLOPE * y1)                 # LeakyReLU(0.01)
    y2 = conv3x3(y1, w2_ref, b2_ref)                       # (3, L)
    o_ref[...] = y2.astype(o_ref.dtype)                    # lane-dense store


def _tap_masks(H, W, dtype=jnp.float32):
    """(9, H*W): masks[t, p] == 1 iff tap t of pixel p reads inside the image."""
    idx = jnp.arange(H * W, dtype=jnp.int32)
    row, col = idx // W, idx % W
    rows = []
    for dy in (-1, 0, 1):
        rv = (row + dy >= 0) & (row + dy < H)
        for dx in (-1, 0, 1):
            cv = (col + dx >= 0) & (col + dx < W)
            rows.append((rv & cv).astype(dtype))
    return jnp.stack(rows, axis=0)


def _pick_images_per_block(N, HW):
    """Images per grid step.

    Constraints / preferences:
      * nb divides N,
      * lane width nb*HW is a multiple of 128 (BlockSpec lane rule) unless the
        block spans the whole batch,
      * >= 2 grid steps when possible (work for both v7x TensorCores),
      * <= ~32K lanes per step (keeps VMEM modest, amortizes ~0.35us/step).
    """
    TARGET_LANES = 32 * 1024
    divisors = [d for d in range(1, N + 1) if N % d == 0]
    legal = [d for d in divisors if d == N or (d * HW) % 128 == 0]
    multi = [d for d in legal if N // d >= 2] or legal
    fitting = [d for d in multi if d * HW <= TARGET_LANES]
    return max(fitting) if fitting else min(multi)


def generator_forward(x_nchw, w1, b1, w2, b2):
    """Forward pass of Generator.

    x_nchw: (N, 3, H, W) float32
    w1: (16, 3, 3, 3), b1: (16,)   (PyTorch OIHW Conv2d layout)
    w2: (3, 16, 3, 3), b2: (3,)
    Returns (N, 3, H, W) float32.
    """
    N, C, H, W = x_nchw.shape
    assert C == C_IN
    HW = H * W

    nb = _pick_images_per_block(N, HW)
    L = nb * HW
    grid = (N // nb,)

    # Channel-major lane batching: (N,3,H,W) -> (3, N*H*W).  One cheap wrapper
    # transpose pass; gives one wide lane stream per grid step.
    x_cm = jnp.transpose(x_nchw, (1, 0, 2, 3)).reshape(C_IN, N * HW).astype(jnp.float32)

    # Per-tap weights: w_taps[ky*3+kx, o, i] = w[o, i, ky, kx].
    w1_taps = jnp.transpose(w1, (2, 3, 0, 1)).reshape(9, C_MID, C_IN).astype(jnp.float32)
    w2_taps = jnp.transpose(w2, (2, 3, 0, 1)).reshape(9, C_OUT, C_MID).astype(jnp.float32)
    b1c = b1.reshape(C_MID, 1).astype(jnp.float32)
    b2c = b2.reshape(C_OUT, 1).astype(jnp.float32)

    # Border masks for one lane block (identical for every grid step -> the
    # constant index_map fetches them once and keeps them resident in VMEM).
    masks = jnp.tile(_tap_masks(H, W), (1, nb))            # (9, L)

    # Per-step VMEM estimate: double-buffered in/out blocks (padded to 8
    # sublanes), resident mask block, plus a few (16, L) f32 temporaries.
    est = 4 * L * (2 * 8 + 2 * 8 + 16 + 4 * 16)
    vmem_limit = int(min(max(32 << 20, 2 * est), 100 << 20))

    kernel = functools.partial(_generator_kernel, W=W)

    out_cm = pl.pallas_call(
        kernel,
        out_shape=jax.ShapeDtypeStruct((C_OUT, N * HW), x_nchw.dtype),
        grid=grid,
        in_specs=[
            pl.BlockSpec((C_IN, L), lambda g: (0, g)),
            pl.BlockSpec((9, L), lambda g: (0, 0)),
            pl.BlockSpec((9, C_MID, C_IN), lambda g: (0, 0, 0)),
            pl.BlockSpec((C_MID, 1), lambda g: (0, 0)),
            pl.BlockSpec((9, C_OUT, C_MID), lambda g: (0, 0, 0)),
            pl.BlockSpec((C_OUT, 1), lambda g: (0, 0)),
        ],
        out_specs=pl.BlockSpec((C_OUT, L), lambda g: (0, g)),
        compiler_params=pltpu.CompilerParams(
            dimension_semantics=("parallel",),
            vmem_limit_bytes=vmem_limit,
        ),
    )(x_cm, masks, w1_taps, b1c, w2_taps, b2c)

    return jnp.transpose(out_cm.reshape(C_OUT, N, H, W), (1, 0, 2, 3))


def _reference_forward(x, w1, b1, w2, b2):
    """Pure-JAX reference (NCHW / OIHW, matches the PyTorch module)."""
    dn = ('NCHW', 'OIHW', 'NCHW')
    y = jax.lax.conv_general_dilated(x, w1, (1, 1), 'SAME', dimension_numbers=dn)
    y = y + b1.reshape(1, C_MID, 1, 1)
    y = jnp.where(y > 0, y, LEAKY_SLOPE * y)
    y = jax.lax.conv_general_dilated(y, w2, (1, 1), 'SAME', dimension_numbers=dn)
    y = y + b2.reshape(1, C_OUT, 1, 1)
    return y


if __name__ == "__main__":
    key = jax.random.PRNGKey(0)
    k_x, k_w1, k_b1, k_w2, k_b2 = jax.random.split(key, 5)

    N, H, W = 2, 16, 16
    x = jax.random.normal(k_x, (N, C_IN, H, W), dtype=jnp.float32)

    # Deterministic synthetic parameters in PyTorch (OIHW) layout.
    w1 = 0.1 * jax.random.normal(k_w1, (C_MID, C_IN, 3, 3), dtype=jnp.float32)
    b1 = 0.1 * jax.random.normal(k_b1, (C_MID,), dtype=jnp.float32)
    w2 = 0.1 * jax.random.normal(k_w2, (C_OUT, C_MID, 3, 3), dtype=jnp.float32)
    b2 = 0.1 * jax.random.normal(k_b2, (C_OUT,), dtype=jnp.float32)

    out = jax.block_until_ready(generator_forward(x, w1, b1, w2, b2))
    ref = _reference_forward(x, w1, b1, w2, b2)

    assert out.shape == (N, C_OUT, H, W)
    assert jnp.allclose(out, ref, atol=2e-4, rtol=2e-4), float(jnp.max(jnp.abs(out - ref)))

    print("KERNEL_OK")
</pallas_src>

<mosaic_0001>
module attributes {stable_mosaic.version = 11 : i64} {
  func.func @_generator_kernel(%arg0: i32, %arg1: memref<3x256xf32, #tpu.memory_space<vmem>>, %arg2: memref<9x256xf32, #tpu.memory_space<vmem>>, %arg3: memref<9x16x3xf32, #tpu.memory_space<vmem>>, %arg4: memref<16x1xf32, #tpu.memory_space<vmem>>, %arg5: memref<9x3x16xf32, #tpu.memory_space<vmem>>, %arg6: memref<3x1xf32, #tpu.memory_space<vmem>>, %arg7: memref<3x256xf32, #tpu.memory_space<vmem>>) attributes {dimension_semantics = [#tpu.dimension_semantics<parallel>], iteration_bounds = array<i64: 2>, scalar_prefetch = 0 : i64, scratch_operands = 0 : i64, tpu.core_type = #tpu.core_type<tc>, window_params = [{transform_indices = @transform_0, window_bounds = array<i64: 3, 256>}, {pipeline_mode = #tpu.pipeline_mode<synchronous>, transform_indices = @transform_1, window_bounds = array<i64: 9, 256>}, {pipeline_mode = #tpu.pipeline_mode<synchronous>, transform_indices = @transform_2, window_bounds = array<i64: 9, 16, 3>}, {pipeline_mode = #tpu.pipeline_mode<synchronous>, transform_indices = @transform_3, window_bounds = array<i64: 16, 1>}, {pipeline_mode = #tpu.pipeline_mode<synchronous>, transform_indices = @transform_4, window_bounds = array<i64: 9, 3, 16>}, {pipeline_mode = #tpu.pipeline_mode<synchronous>, transform_indices = @transform_5, window_bounds = array<i64: 3, 1>}, {transform_indices = @transform_6, window_bounds = array<i64: 3, 256>}]} {
    %c0 = arith.constant 0 : index
    %c0_0 = arith.constant 0 : index
    %0 = vector.load %arg2[%c0, %c0_0] : memref<9x256xf32, #tpu.memory_space<vmem>>, vector<9x256xf32>
    %1 = vector.extract_strided_slice %0 {offsets = [0, 0], sizes = [1, 256], strides = [1, 1]} : vector<9x256xf32> to vector<1x256xf32>
    %2 = vector.extract_strided_slice %0 {offsets = [1, 0], sizes = [1, 256], strides = [1, 1]} : vector<9x256xf32> to vector<1x256xf32>
    %3 = vector.extract_strided_slice %0 {offsets = [2, 0], sizes = [1, 256], strides = [1, 1]} : vector<9x256xf32> to vector<1x256xf32>
    %4 = vector.extract_strided_slice %0 {offsets = [3, 0], sizes = [1, 256], strides = [1, 1]} : vector<9x256xf32> to vector<1x256xf32>
    %5 = vector.extract_strided_slice %0 {offsets = [5, 0], sizes = [1, 256], strides = [1, 1]} : vector<9x256xf32> to vector<1x256xf32>
    %6 = vector.extract_strided_slice %0 {offsets = [6, 0], sizes = [1, 256], strides = [1, 1]} : vector<9x256xf32> to vector<1x256xf32>
    %7 = vector.extract_strided_slice %0 {offsets = [7, 0], sizes = [1, 256], strides = [1, 1]} : vector<9x256xf32> to vector<1x256xf32>
    %8 = vector.extract_strided_slice %0 {offsets = [8, 0], sizes = [1, 256], strides = [1, 1]} : vector<9x256xf32> to vector<1x256xf32>
    %c0_1 = arith.constant 0 : index
    %c0_2 = arith.constant 0 : index
    %9 = vector.load %arg1[%c0_1, %c0_2] : memref<3x256xf32, #tpu.memory_space<vmem>>, vector<3x256xf32>
    %c4 = arith.constant 4 : index
    %c0_3 = arith.constant 0 : index
    %c0_4 = arith.constant 0 : index
    %10 = vector.load %arg3[%c4, %c0_3, %c0_4] : memref<9x16x3xf32, #tpu.memory_space<vmem>>, vector<1x16x3xf32>
    %11 = vector.shape_cast %10 : vector<1x16x3xf32> to vector<16x3xf32>
    %cst = arith.constant dense<0.000000e+00> : vector<16x256xf32>
    %12 = tpu.matmul %11, %9, %cst {dimension_numbers = #tpu.dot_dimension_numbers<[1], [0], [0], [1], [0, 0, 1, 1], [], []>} : vector<16x3xf32>, vector<3x256xf32>, vector<16x256xf32> -> vector<16x256xf32>
    %c17_i32 = arith.constant 17 : i32
    %13 = tpu.dynamic_rotate %9 by %c17_i32 dim 1 : vector<3x256xf32>, i32 -> vector<3x256xf32>
    %14 = vector.broadcast %1 : vector<1x256xf32> to vector<3x256xf32>
    %15 = arith.mulf %13, %14 : vector<3x256xf32>
    %c0_5 = arith.constant 0 : index
    %c0_6 = arith.constant 0 : index
    %c0_7 = arith.constant 0 : index
    %16 = vector.load %arg3[%c0_5, %c0_6, %c0_7] : memref<9x16x3xf32, #tpu.memory_space<vmem>>, vector<1x16x3xf32>
    %17 = vector.shape_cast %16 : vector<1x16x3xf32> to vector<16x3xf32>
    %cst_8 = arith.constant dense<0.000000e+00> : vector<16x256xf32>
    %18 = tpu.matmul %17, %15, %cst_8 {dimension_numbers = #tpu.dot_dimension_numbers<[1], [0], [0], [1], [0, 0, 1, 1], [], []>} : vector<16x3xf32>, vector<3x256xf32>, vector<16x256xf32> -> vector<16x256xf32>
    %19 = arith.addf %12, %18 : vector<16x256xf32>
    %c16_i32 = arith.constant 16 : i32
    %20 = tpu.dynamic_rotate %9 by %c16_i32 dim 1 : vector<3x256xf32>, i32 -> vector<3x256xf32>
    %21 = vector.broadcast %2 : vector<1x256xf32> to vector<3x256xf32>
    %22 = arith.mulf %20, %21 : vector<3x256xf32>
    %c1 = arith.constant 1 : index
    %c0_9 = arith.constant 0 : index
    %c0_10 = arith.constant 0 : index
    %23 = vector.load %arg3[%c1, %c0_9, %c0_10] : memref<9x16x3xf32, #tpu.memory_space<vmem>>, vector<1x16x3xf32>
    %24 = vector.shape_cast %23 : vector<1x16x3xf32> to vector<16x3xf32>
    %cst_11 = arith.constant dense<0.000000e+00> : vector<16x256xf32>
    %25 = tpu.matmul %24, %22, %cst_11 {dimension_numbers = #tpu.dot_dimension_numbers<[1], [0], [0], [1], [0, 0, 1, 1], [], []>} : vector<16x3xf32>, vector<3x256xf32>, vector<16x256xf32> -> vector<16x256xf32>
    %26 = arith.addf %19, %25 : vector<16x256xf32>
    %c15_i32 = arith.constant 15 : i32
    %27 = tpu.dynamic_rotate %9 by %c15_i32 dim 1 : vector<3x256xf32>, i32 -> vector<3x256xf32>
    %28 = vector.broadcast %3 : vector<1x256xf32> to vector<3x256xf32>
    %29 = arith.mulf %27, %28 : vector<3x256xf32>
    %c2 = arith.constant 2 : index
    %c0_12 = arith.constant 0 : index
    %c0_13 = arith.constant 0 : index
    %30 = vector.load %arg3[%c2, %c0_12, %c0_13] : memref<9x16x3xf32, #tpu.memory_space<vmem>>, vector<1x16x3xf32>
    %31 = vector.shape_cast %30 : vector<1x16x3xf32> to vector<16x3xf32>
    %cst_14 = arith.constant dense<0.000000e+00> : vector<16x256xf32>
    %32 = tpu.matmul %31, %29, %cst_14 {dimension_numbers = #tpu.dot_dimension_numbers<[1], [0], [0], [1], [0, 0, 1, 1], [], []>} : vector<16x3xf32>, vector<3x256xf32>, vector<16x256xf32> -> vector<16x256xf32>
    %33 = arith.addf %26, %32 : vector<16x256xf32>
    %c1_i32 = arith.constant 1 : i32
    %34 = tpu.dynamic_rotate %9 by %c1_i32 dim 1 : vector<3x256xf32>, i32 -> vector<3x256xf32>
    %35 = vector.broadcast %4 : vector<1x256xf32> to vector<3x256xf32>
    %36 = arith.mulf %34, %35 : vector<3x256xf32>
    %c3 = arith.constant 3 : index
    %c0_15 = arith.constant 0 : index
    %c0_16 = arith.constant 0 : index
    %37 = vector.load %arg3[%c3, %c0_15, %c0_16] : memref<9x16x3xf32, #tpu.memory_space<vmem>>, vector<1x16x3xf32>
    %38 = vector.shape_cast %37 : vector<1x16x3xf32> to vector<16x3xf32>
    %cst_17 = arith.constant dense<0.000000e+00> : vector<16x256xf32>
    %39 = tpu.matmul %38, %36, %cst_17 {dimension_numbers = #tpu.dot_dimension_numbers<[1], [0], [0], [1], [0, 0, 1, 1], [], []>} : vector<16x3xf32>, vector<3x256xf32>, vector<16x256xf32> -> vector<16x256xf32>
    %40 = arith.addf %33, %39 : vector<16x256xf32>
    %c255_i32 = arith.constant 255 : i32
    %41 = tpu.dynamic_rotate %9 by %c255_i32 dim 1 : vector<3x256xf32>, i32 -> vector<3x256xf32>
    %42 = vector.broadcast %5 : vector<1x256xf32> to vector<3x256xf32>
    %43 = arith.mulf %41, %42 : vector<3x256xf32>
    %c5 = arith.constant 5 : index
    %c0_18 = arith.constant 0 : index
    %c0_19 = arith.constant 0 : index
    %44 = vector.load %arg3[%c5, %c0_18, %c0_19] : memref<9x16x3xf32, #tpu.memory_space<vmem>>, vector<1x16x3xf32>
    %45 = vector.shape_cast %44 : vector<1x16x3xf32> to vector<16x3xf32>
    %cst_20 = arith.constant dense<0.000000e+00> : vector<16x256xf32>
    %46 = tpu.matmul %45, %43, %cst_20 {dimension_numbers = #tpu.dot_dimension_numbers<[1], [0], [0], [1], [0, 0, 1, 1], [], []>} : vector<16x3xf32>, vector<3x256xf32>, vector<16x256xf32> -> vector<16x256xf32>
    %47 = arith.addf %40, %46 : vector<16x256xf32>
    %c241_i32 = arith.constant 241 : i32
    %48 = tpu.dynamic_rotate %9 by %c241_i32 dim 1 : vector<3x256xf32>, i32 -> vector<3x256xf32>
    %49 = vector.broadcast %6 : vector<1x256xf32> to vector<3x256xf32>
    %50 = arith.mulf %48, %49 : vector<3x256xf32>
    %c6 = arith.constant 6 : index
    %c0_21 = arith.constant 0 : index
    %c0_22 = arith.constant 0 : index
    %51 = vector.load %arg3[%c6, %c0_21, %c0_22] : memref<9x16x3xf32, #tpu.memory_space<vmem>>, vector<1x16x3xf32>
    %52 = vector.shape_cast %51 : vector<1x16x3xf32> to vector<16x3xf32>
    %cst_23 = arith.constant dense<0.000000e+00> : vector<16x256xf32>
    %53 = tpu.matmul %52, %50, %cst_23 {dimension_numbers = #tpu.dot_dimension_numbers<[1], [0], [0], [1], [0, 0, 1, 1], [], []>} : vector<16x3xf32>, vector<3x256xf32>, vector<16x256xf32> -> vector<16x256xf32>
    %54 = arith.addf %47, %53 : vector<16x256xf32>
    %c240_i32 = arith.constant 240 : i32
    %55 = tpu.dynamic_rotate %9 by %c240_i32 dim 1 : vector<3x256xf32>, i32 -> vector<3x256xf32>
    %56 = vector.broadcast %7 : vector<1x256xf32> to vector<3x256xf32>
    %57 = arith.mulf %55, %56 : vector<3x256xf32>
    %c7 = arith.constant 7 : index
    %c0_24 = arith.constant 0 : index
    %c0_25 = arith.constant 0 : index
    %58 = vector.load %arg3[%c7, %c0_24, %c0_25] : memref<9x16x3xf32, #tpu.memory_space<vmem>>, vector<1x16x3xf32>
    %59 = vector.shape_cast %58 : vector<1x16x3xf32> to vector<16x3xf32>
    %cst_26 = arith.constant dense<0.000000e+00> : vector<16x256xf32>
    %60 = tpu.matmul %59, %57, %cst_26 {dimension_numbers = #tpu.dot_dimension_numbers<[1], [0], [0], [1], [0, 0, 1, 1], [], []>} : vector<16x3xf32>, vector<3x256xf32>, vector<16x256xf32> -> vector<16x256xf32>
    %61 = arith.addf %54, %60 : vector<16x256xf32>
    %c239_i32 = arith.constant 239 : i32
    %62 = tpu.dynamic_rotate %9 by %c239_i32 dim 1 : vector<3x256xf32>, i32 -> vector<3x256xf32>
    %63 = vector.broadcast %8 : vector<1x256xf32> to vector<3x256xf32>
    %64 = arith.mulf %62, %63 : vector<3x256xf32>
    %c8 = arith.constant 8 : index
    %c0_27 = arith.constant 0 : index
    %c0_28 = arith.constant 0 : index
    %65 = vector.load %arg3[%c8, %c0_27, %c0_28] : memref<9x16x3xf32, #tpu.memory_space<vmem>>, vector<1x16x3xf32>
    %66 = vector.shape_cast %65 : vector<1x16x3xf32> to vector<16x3xf32>
    %cst_29 = arith.constant dense<0.000000e+00> : vector<16x256xf32>
    %67 = tpu.matmul %66, %64, %cst_29 {dimension_numbers = #tpu.dot_dimension_numbers<[1], [0], [0], [1], [0, 0, 1, 1], [], []>} : vector<16x3xf32>, vector<3x256xf32>, vector<16x256xf32> -> vector<16x256xf32>
    %68 = arith.addf %61, %67 : vector<16x256xf32>
    %c0_30 = arith.constant 0 : index
    %c0_31 = arith.constant 0 : index
    %69 = vector.load %arg4[%c0_30, %c0_31] : memref<16x1xf32, #tpu.memory_space<vmem>>, vector<16x1xf32>
    %70 = vector.broadcast %69 : vector<16x1xf32> to vector<16x256xf32>
    %71 = arith.addf %68, %70 : vector<16x256xf32>
    %cst_32 = arith.constant 0.00999999977 : f32
    %72 = vector.broadcast %cst_32 : f32 to vector<16x256xf32>
    %73 = arith.mulf %72, %71 : vector<16x256xf32>
    %74 = arith.maximumf %71, %73 : vector<16x256xf32>
    %c4_33 = arith.constant 4 : index
    %c0_34 = arith.constant 0 : index
    %c0_35 = arith.constant 0 : index
    %75 = vector.load %arg5[%c4_33, %c0_34, %c0_35] : memref<9x3x16xf32, #tpu.memory_space<vmem>>, vector<1x3x16xf32>
    %76 = vector.shape_cast %75 : vector<1x3x16xf32> to vector<3x16xf32>
    %cst_36 = arith.constant dense<0.000000e+00> : vector<3x256xf32>
    %77 = tpu.matmul %76, %74, %cst_36 {dimension_numbers = #tpu.dot_dimension_numbers<[1], [0], [0], [1], [0, 0, 1, 1], [], []>} : vector<3x16xf32>, vector<16x256xf32>, vector<3x256xf32> -> vector<3x256xf32>
    %c17_i32_37 = arith.constant 17 : i32
    %78 = tpu.dynamic_rotate %74 by %c17_i32_37 dim 1 : vector<16x256xf32>, i32 -> vector<16x256xf32>
    %79 = vector.broadcast %1 : vector<1x256xf32> to vector<16x256xf32>
    %80 = arith.mulf %78, %79 : vector<16x256xf32>
    %c0_38 = arith.constant 0 : index
    %c0_39 = arith.constant 0 : index
    %c0_40 = arith.constant 0 : index
    %81 = vector.load %arg5[%c0_38, %c0_39, %c0_40] : memref<9x3x16xf32, #tpu.memory_space<vmem>>, vector<1x3x16xf32>
    %82 = vector.shape_cast %81 : vector<1x3x16xf32> to vector<3x16xf32>
    %cst_41 = arith.constant dense<0.000000e+00> : vector<3x256xf32>
    %83 = tpu.matmul %82, %80, %cst_41 {dimension_numbers = #tpu.dot_dimension_numbers<[1], [0], [0], [1], [0, 0, 1, 1], [], []>} : vector<3x16xf32>, vector<16x256xf32>, vector<3x256xf32> -> vector<3x256xf32>
    %84 = arith.addf %77, %83 : vector<3x256xf32>
    %c16_i32_42 = arith.constant 16 : i32
    %85 = tpu.dynamic_rotate %74 by %c16_i32_42 dim 1 : vector<16x256xf32>, i32 -> vector<16x256xf32>
    %86 = vector.broadcast %2 : vector<1x256xf32> to vector<16x256xf32>
    %87 = arith.mulf %85, %86 : vector<16x256xf32>
    %c1_43 = arith.constant 1 : index
    %c0_44 = arith.constant 0 : index
    %c0_45 = arith.constant 0 : index
    %88 = vector.load %arg5[%c1_43, %c0_44, %c0_45] : memref<9x3x16xf32, #tpu.memory_space<vmem>>, vector<1x3x16xf32>
    %89 = vector.shape_cast %88 : vector<1x3x16xf32> to vector<3x16xf32>
    %cst_46 = arith.constant dense<0.000000e+00> : vector<3x256xf32>
    %90 = tpu.matmul %89, %87, %cst_46 {dimension_numbers = #tpu.dot_dimension_numbers<[1], [0], [0], [1], [0, 0, 1, 1], [], []>} : vector<3x16xf32>, vector<16x256xf32>, vector<3x256xf32> -> vector<3x256xf32>
    %91 = arith.addf %84, %90 : vector<3x256xf32>
    %c15_i32_47 = arith.constant 15 : i32
    %92 = tpu.dynamic_rotate %74 by %c15_i32_47 dim 1 : vector<16x256xf32>, i32 -> vector<16x256xf32>
    %93 = vector.broadcast %3 : vector<1x256xf32> to vector<16x256xf32>
    %94 = arith.mulf %92, %93 : vector<16x256xf32>
    %c2_48 = arith.constant 2 : index
    %c0_49 = arith.constant 0 : index
    %c0_50 = arith.constant 0 : index
    %95 = vector.load %arg5[%c2_48, %c0_49, %c0_50] : memref<9x3x16xf32, #tpu.memory_space<vmem>>, vector<1x3x16xf32>
    %96 = vector.shape_cast %95 : vector<1x3x16xf32> to vector<3x16xf32>
    %cst_51 = arith.constant dense<0.000000e+00> : vector<3x256xf32>
    %97 = tpu.matmul %96, %94, %cst_51 {dimension_numbers = #tpu.dot_dimension_numbers<[1], [0], [0], [1], [0, 0, 1, 1], [], []>} : vector<3x16xf32>, vector<16x256xf32>, vector<3x256xf32> -> vector<3x256xf32>
    %98 = arith.addf %91, %97 : vector<3x256xf32>
    %c1_i32_52 = arith.constant 1 : i32
    %99 = tpu.dynamic_rotate %74 by %c1_i32_52 dim 1 : vector<16x256xf32>, i32 -> vector<16x256xf32>
    %100 = vector.broadcast %4 : vector<1x256xf32> to vector<16x256xf32>
    %101 = arith.mulf %99, %100 : vector<16x256xf32>
    %c3_53 = arith.constant 3 : index
    %c0_54 = arith.constant 0 : index
    %c0_55 = arith.constant 0 : index
    %102 = vector.load %arg5[%c3_53, %c0_54, %c0_55] : memref<9x3x16xf32, #tpu.memory_space<vmem>>, vector<1x3x16xf32>
    %103 = vector.shape_cast %102 : vector<1x3x16xf32> to vector<3x16xf32>
    %cst_56 = arith.constant dense<0.000000e+00> : vector<3x256xf32>
    %104 = tpu.matmul %103, %101, %cst_56 {dimension_numbers = #tpu.dot_dimension_numbers<[1], [0], [0], [1], [0, 0, 1, 1], [], []>} : vector<3x16xf32>, vector<16x256xf32>, vector<3x256xf32> -> vector<3x256xf32>
    %105 = arith.addf %98, %104 : vector<3x256xf32>
    %c255_i32_57 = arith.constant 255 : i32
    %106 = tpu.dynamic_rotate %74 by %c255_i32_57 dim 1 : vector<16x256xf32>, i32 -> vector<16x256xf32>
    %107 = vector.broadcast %5 : vector<1x256xf32> to vector<16x256xf32>
    %108 = arith.mulf %106, %107 : vector<16x256xf32>
    %c5_58 = arith.constant 5 : index
    %c0_59 = arith.constant 0 : index
    %c0_60 = arith.constant 0 : index
    %109 = vector.load %arg5[%c5_58, %c0_59, %c0_60] : memref<9x3x16xf32, #tpu.memory_space<vmem>>, vector<1x3x16xf32>
    %110 = vector.shape_cast %109 : vector<1x3x16xf32> to vector<3x16xf32>
    %cst_61 = arith.constant dense<0.000000e+00> : vector<3x256xf32>
    %111 = tpu.matmul %110, %108, %cst_61 {dimension_numbers = #tpu.dot_dimension_numbers<[1], [0], [0], [1], [0, 0, 1, 1], [], []>} : vector<3x16xf32>, vector<16x256xf32>, vector<3x256xf32> -> vector<3x256xf32>
    %112 = arith.addf %105, %111 : vector<3x256xf32>
    %c241_i32_62 = arith.constant 241 : i32
    %113 = tpu.dynamic_rotate %74 by %c241_i32_62 dim 1 : vector<16x256xf32>, i32 -> vector<16x256xf32>
    %114 = vector.broadcast %6 : vector<1x256xf32> to vector<16x256xf32>
    %115 = arith.mulf %113, %114 : vector<16x256xf32>
    %c6_63 = arith.constant 6 : index
    %c0_64 = arith.constant 0 : index
    %c0_65 = arith.constant 0 : index
    %116 = vector.load %arg5[%c6_63, %c0_64, %c0_65] : memref<9x3x16xf32, #tpu.memory_space<vmem>>, vector<1x3x16xf32>
    %117 = vector.shape_cast %116 : vector<1x3x16xf32> to vector<3x16xf32>
    %cst_66 = arith.constant dense<0.000000e+00> : vector<3x256xf32>
    %118 = tpu.matmul %117, %115, %cst_66 {dimension_numbers = #tpu.dot_dimension_numbers<[1], [0], [0], [1], [0, 0, 1, 1], [], []>} : vector<3x16xf32>, vector<16x256xf32>, vector<3x256xf32> -> vector<3x256xf32>
    %119 = arith.addf %112, %118 : vector<3x256xf32>
    %c240_i32_67 = arith.constant 240 : i32
    %120 = tpu.dynamic_rotate %74 by %c240_i32_67 dim 1 : vector<16x256xf32>, i32 -> vector<16x256xf32>
    %121 = vector.broadcast %7 : vector<1x256xf32> to vector<16x256xf32>
    %122 = arith.mulf %120, %121 : vector<16x256xf32>
    %c7_68 = arith.constant 7 : index
    %c0_69 = arith.constant 0 : index
    %c0_70 = arith.constant 0 : index
    %123 = vector.load %arg5[%c7_68, %c0_69, %c0_70] : memref<9x3x16xf32, #tpu.memory_space<vmem>>, vector<1x3x16xf32>
    %124 = vector.shape_cast %123 : vector<1x3x16xf32> to vector<3x16xf32>
    %cst_71 = arith.constant dense<0.000000e+00> : vector<3x256xf32>
    %125 = tpu.matmul %124, %122, %cst_71 {dimension_numbers = #tpu.dot_dimension_numbers<[1], [0], [0], [1], [0, 0, 1, 1], [], []>} : vector<3x16xf32>, vector<16x256xf32>, vector<3x256xf32> -> vector<3x256xf32>
    %126 = arith.addf %119, %125 : vector<3x256xf32>
    %c239_i32_72 = arith.constant 239 : i32
    %127 = tpu.dynamic_rotate %74 by %c239_i32_72 dim 1 : vector<16x256xf32>, i32 -> vector<16x256xf32>
    %128 = vector.broadcast %8 : vector<1x256xf32> to vector<16x256xf32>
    %129 = arith.mulf %127, %128 : vector<16x256xf32>
    %c8_73 = arith.constant 8 : index
    %c0_74 = arith.constant 0 : index
    %c0_75 = arith.constant 0 : index
    %130 = vector.load %arg5[%c8_73, %c0_74, %c0_75] : memref<9x3x16xf32, #tpu.memory_space<vmem>>, vector<1x3x16xf32>
    %131 = vector.shape_cast %130 : vector<1x3x16xf32> to vector<3x16xf32>
    %cst_76 = arith.constant dense<0.000000e+00> : vector<3x256xf32>
    %132 = tpu.matmul %131, %129, %cst_76 {dimension_numbers = #tpu.dot_dimension_numbers<[1], [0], [0], [1], [0, 0, 1, 1], [], []>} : vector<3x16xf32>, vector<16x256xf32>, vector<3x256xf32> -> vector<3x256xf32>
    %133 = arith.addf %126, %132 : vector<3x256xf32>
    %c0_77 = arith.constant 0 : index
    %c0_78 = arith.constant 0 : index
    %134 = vector.load %arg6[%c0_77, %c0_78] : memref<3x1xf32, #tpu.memory_space<vmem>>, vector<3x1xf32>
    %135 = vector.broadcast %134 : vector<3x1xf32> to vector<3x256xf32>
    %136 = arith.addf %133, %135 : vector<3x256xf32>
    %c0_79 = arith.constant 0 : index
    %c0_80 = arith.constant 0 : index
    %137 = vector.load %arg7[%c0_79, %c0_80] : memref<3x256xf32, #tpu.memory_space<vmem>>, vector<3x256xf32>
    tpu.vector_store %arg7[%c0_79, %c0_80], %136 {strides = array<i32>} : memref<3x256xf32, #tpu.memory_space<vmem>>, vector<3x256xf32>,
    return
  }
  func.func @transform_0(%arg0: i32) -> (i32, i32) {
    %c0_i32 = arith.constant 0 : i32
    %c0_i32_0 = arith.constant 0 : i32
    return %c0_i32, %arg0 : i32, i32
  }
  func.func @transform_1(%arg0: i32) -> (i32, i32) {
    %c0_i32 = arith.constant 0 : i32
    %c0_i32_0 = arith.constant 0 : i32
    %c0_i32_1 = arith.constant 0 : i32
    return %c0_i32, %c0_i32_0 : i32, i32
  }
  func.func @transform_2(%arg0: i32) -> (i32, i32, i32) {
    %c0_i32 = arith.constant 0 : i32
    %c0_i32_0 = arith.constant 0 : i32
    %c0_i32_1 = arith.constant 0 : i32
    %c0_i32_2 = arith.constant 0 : i32
    return %c0_i32, %c0_i32_0, %c0_i32_1 : i32, i32, i32
  }
  func.func @transform_3(%arg0: i32) -> (i32, i32) {
    %c0_i32 = arith.constant 0 : i32
    %c0_i32_0 = arith.constant 0 : i32
    %c0_i32_1 = arith.constant 0 : i32
    return %c0_i32, %c0_i32_0 : i32, i32
  }
  func.func @transform_4(%arg0: i32) -> (i32, i32, i32) {
    %c0_i32 = arith.constant 0 : i32
    %c0_i32_0 = arith.constant 0 : i32
    %c0_i32_1 = arith.constant 0 : i32
    %c0_i32_2 = arith.constant 0 : i32
    return %c0_i32, %c0_i32_0, %c0_i32_1 : i32, i32, i32
  }
  func.func @transform_5(%arg0: i32) -> (i32, i32) {
    %c0_i32 = arith.constant 0 : i32
    %c0_i32_0 = arith.constant 0 : i32
    %c0_i32_1 = arith.constant 0 : i32
    return %c0_i32, %c0_i32_0 : i32, i32
  }
  func.func @transform_6(%arg0: i32) -> (i32, i32) {
    %c0_i32 = arith.constant 0 : i32
    %c0_i32_0 = arith.constant 0 : i32
    return %c0_i32, %arg0 : i32, i32
  }
}

</mosaic_0001>

<bundles_post_ra>
// kernel: tpu_custom_call.1
= control target key start
LH: loop header
LB: loop body
LE: loop exit
PB: predicated region body
PF: predicated region fallthrough
CT: control target
= control target key end

     0   :  { %11 = vsyncpa [#allocation3], 0  ;;  %s3013_s0 = inlined_call_operand.vmem [shape: f32[3,512], index: 0, kind: input, shape index: {}]   ;;  %s3014_s1 = inlined_call_operand.vmem [shape: f32[9,256], index: 1, kind: input, shape index: {}]   ;;  %s3015_s2 = inlined_call_operand.vmem [shape: f32[9,16,3], index: 2, kind: input, shape index: {}]   ;;  %s3016_s3 = inlined_call_operand.vmem [shape: f32[16,1], index: 3, kind: input, shape index: {}]   ;;  %s3017_s4 = inlined_call_operand.vmem [shape: f32[9,3,16], index: 4, kind: input, shape index: {}]   ;;  %s3018_s5 = inlined_call_operand.vmem [shape: f32[3,1], index: 5, kind: input, shape index: {}]   ;;  %s3019_s6 = inlined_call_operand.hbm [shape: f32[3,512], index: 6, kind: output, shape index: {}]  }
   0x1   :  { %13 = vsyncpa [#allocation3 + $0x1], 0  ;;  %s2435_s21 = smov 0   ;;  %s2437_s22 = smov 0  }
   0x2   :  { %s2439_s23 = smov 0   ;;  %s2441_s24 = smov 0  }
   0x3 LB: > { %s2456_s25 = sadd.s32 4294967295, %s2387_s24   ;;  %s2191_s26 = sadd.s32 4294967294, %s2387_s24   ;;  %s2387_s24 = sphi %s2441_s24, %s3028_s24   ;;  %s2383_s23 = sphi %s2439_s23, %s3027_s23   ;;  %s2379_s22 = sphi %s2437_s22, %s3026_s22   ;;  %s2375_s21 = sphi %s2435_s21, %s3025_s21  }
   0x4   : > { %s2460_s27 = sadd.s32 1, %s2387_s24   ;;  %s157_s28 = sadd.s32 1, %s2383_s23 }
   0x5   : > { %s154_s29 = ssub.s32 %s2387_s24, %s2460_s27  ;;  %p167_p0 = scmp.ne.s32.totalorder %s2383_s23, %s2379_s22 }
   0x6   : > { %p155_p1 = scmp.eq.s32.totalorder %s154_s29, 0  ;;  %p168_p2 = scmp.eq.s32.totalorder %s2456_s25, 1 }
   0x7   : > { %p173_p3 = scmp.ne.s32.totalorder %s2379_s22, %s2375_s21  ;;  %p174_p4 = scmp.eq.s32.totalorder %s2191_s26, 1 }
   0x8   : > { %s2471_s30 = scalar_select %p155_p1, %s2383_s23, %s157_s28  }
   0x9   : > { %p2473_p5 = por %p168_p2, %p167_p0  ;;  %p2477_p6 = por %p174_p4, %p173_p3 }
   0xa   : > { %p2194_p7 = scmp.ge.s32.totalorder %s2387_s24, 1  ;;  %p216_p8 = scmp.lt.s32.totalorder %s2387_s24, 3 }
   0xc   : > { %p217_p9 = pnand %p2194_p7, %p216_p8 }
   0xd   : > { %s2196_s9 = sshll.u32 (!%p217_p9), %s2456_s25, 1  ;;  %s2390_s14 = smov (!%p217_p9), 16  }
   0xe   : > { %220 = sbr.rel (%p217_p9) target bundleno = 776 (0x308), region = 44  ;;  %p247_p10 = scmp.lt.s32.totalorder (!%p217_p9), %s2196_s9, 3 }
   0xf   : > { %s2391_s15 = smov (!%p217_p9), 17   ;;  %s2392_s20 = smov (!%p217_p9), 15  }
  0x10   : > { %s2393_s26 = smov (!%p217_p9), 1   ;;  %s2394_s28 = smov (!%p217_p9), 127  }
  0x11   : > { %s2395_s29 = smov (!%p217_p9), 113   ;;  %s2274_s11 = sshll.u32 (!%p217_p9), %s2456_s25, 7 }
  0x13   : > { %s3030_s9 = smov (!%p247_p10, %s2196_s9), 3  ;;  %v2389_v0 = vmov 0.0   ;;  %vm292_vm0 = vcmask 1042432   ;;  %vm285_vm1 = vcmask 23552   ;;  %v2198_v3 = vld [vmem:[%s3015_s2 + $0x40] sm:$0xff]  ;;  %v2199_v4 = vld [vmem:[%s3015_s2 + $0x48] sm:$0xff]  ;;  %v268_v8 = vlaneseq }
  0x14   : > { %363 = vmatprep.mubr.f32.mxu0 %v2389_v0  ;;  %450 = vmatprep.mubr.f32.mxu1 %v2389_v0  ;;  %s2197_s10 = sshll.u32 %s3030_s9, 2  ;;  %s2396_s9 = smov 112   ;;  %v1254_v5 = vld [vmem:[%s3016_s3] sm:$0xff]  ;;  %v1255_v6 = vld [vmem:[%s3016_s3 + $0x8] sm:$0xff]  ;;  %v2398_v7 = vmov 0   ;;  %v2208_v56 = vld [vmem:[%s3015_s2 + $0x10] sm:$0xff] }
  0x15   : > { %s250_s13 = scalar_lea.vmem %s3013_s0, %s2197_s10  ;;  %s3020_s10 = smov 111   ;;  %2325 = vset.pattern.permute.xlu1 %v2398_v7  ;;  %2324 = vset.pattern.permute.xlu0 %v2398_v7  ;;  %v2523_v9 = vshrl.u32 %v268_v8, 7  ;;  %v2525_v10 = vand.u32 127, %v268_v8  ;;  %v2532_v13 = vld [vmem:[%s3014_s1] sm:$0xff]  ;;  %v2537_v14 = vld [vmem:[%s3014_s1 + $0x8] sm:$0xff]  ;;  %vm1297_vm10 = vcmask 130048  }
  0x16   : > { %v257_v1 = vld [vmem:[%s250_s13] sm:$0x77]  ;;  %v284_v45 = vld [vmem:[%s3015_s2 + $0x8] sm:$0xff] }
  0x17   : > { %463 = vrot.lane.b32.xlu1 %v257_v1, %s2390_s14  ;;  %264 = vrot.lane.b32.xlu0 %v257_v1, %s2391_s15  ;;  %v262_v2 = vcombine.high %v257_v1, %v257_v1  ;;  %v472_v11 = vsub.s32 1, %v2523_v9  ;;  %v275_v12 = vsub.s32 0, %v2523_v9  ;;  %v585_v17 = vsub.s32 2, %v2523_v9  ;;  %v283_v35 = vld [vmem:[%s3015_s2] sm:$0xff]  ;;  %v2215_v57 = vld [vmem:[%s3015_s2 + $0x28] sm:$0xff] }
  0x18   : > { %vm467_vm2 = vcmp.lt.s32.totalorder %v2525_v10, 16  ;;  %vm270_vm3 = vcmp.lt.s32.totalorder %v2525_v10, 17  ;;  %vm580_vm4 = vcmp.lt.s32.totalorder %v2525_v10, 15  ;;  %v698_v33 = vsub.s32 3, %v2523_v9  ;;  %v2214_v46 = vld [vmem:[%s3015_s2 + $0x20] sm:$0xff] }
  0x19   : > { %2204 = vmatprep.subr.msk.mxu1 %vm292_vm0, %v262_v2  ;;  %v2542_v18 = vrot.slane %v2537_v14, %v472_v11  ;;  %v2546_v19 = vrot.slane %v2532_v13, %v275_v12  ;;  %v2549_v20 = vrot.slane %v2537_v14, %v275_v12  ;;  %v2552_v21 = vrot.slane %v2532_v13, %v472_v11 }
  0x1a   : > { %2205 = vmatpush1.msk.msra.mxu1 %vm292_vm0, %v257_v1  ;;  %v2556_v24 = vrot.slane %v2532_v13, %v585_v17  ;;  %v2559_v25 = vrot.slane %v2537_v14, %v585_v17  ;;  %vm693_vm5 = vcmp.lt.s32.totalorder %v2525_v10, 1  ;;  %v2589_v42 = vrot.slane %v2537_v14, %v698_v33  ;;  %v2220_v17 = vld [vmem:[%s3015_s2 + $0x30] sm:$0xff] }
  0x1b   : > { %465 = vrot.lane.b32.xlu1 %v262_v2, %s2390_s14  ;;  %266 = vrot.lane.b32.xlu0 %v262_v2, %s2391_s15  ;;  %v811_v43 = vsub.s32 5, %v2523_v9  ;;  %v2595_v44 = vrot.slane %v2532_v13, %v698_v33  ;;  %vm806_vm6 = vcmp.lt.s32.totalorder %v2525_v10, 127  ;;  %v924_v54 = vsub.s32 6, %v2523_v9  ;;  %v2706_v33 = vld [vmem:[%s3014_s1 + $0x10] ss:$0 sm:$0xff] }
  0x1c   : > { %2206 = vmatmul.mubr.msk.f32.vlgmr.msra.gmra.mxu1 %vm285_vm1, %v2198_v3  ;;  %vm919_vm7 = vcmp.lt.s32.totalorder %v2525_v10, 113  ;;  %vm1032_vm8 = vcmp.lt.s32.totalorder %v2525_v10, 112  ;;  %vm1145_vm9 = vcmp.lt.s32.totalorder %v2525_v10, 111 }
  0x1d   : > { %456 = vmatprep.mubr.f32.mxu1 %v2389_v0  ;;  %v2613_v52 = vrot.slane %v2532_v13, %v811_v43  ;;  %v2616_v53 = vrot.slane %v2537_v14, %v811_v43  ;;  %v2646_v3 = vrot.slane %v2532_v13, %v924_v54  ;;  %v2246_v43 = vld [vmem:[%s3015_s2 + $0x80] sm:$0xff] }
  0x1f   : > { %578 = vrot.lane.b32.xlu1 %v262_v2, %s2392_s20  ;;  %576 = vrot.lane.b32.xlu0 %v257_v1, %s2392_s20 }
  0x20   : > { %2207 = vmatmul.mubr.msk.f32.gmra.mxu1 %vm285_vm1, %v2199_v4  ;;  %v2209_v4 = vld [vmem:[%s3015_s2 + $0x18] sm:$0xff] }
  0x21   : > { %672 = vmatprep.mubr.f32.mxu1 %v2389_v0 }
  0x23   : > { %691 = vrot.lane.b32.xlu1 %v262_v2, %s2393_s26  ;;  %689 = vrot.lane.b32.xlu0 %v257_v1, %s2393_s26 }
  0x27   : > { %804 = vrot.lane.b32.xlu1 %v262_v2, %s2394_s28  ;;  %802 = vrot.lane.b32.xlu0 %v257_v1, %s2394_s28 }
  0x2b   : > { %917 = vrot.lane.b32.xlu1 %v262_v2, %s2395_s29  ;;  %915 = vrot.lane.b32.xlu0 %v257_v1, %s2395_s29 }
  0x2f   : > { %1030 = vrot.lane.b32.xlu1 %v262_v2, %s2396_s9  ;;  %1028 = vrot.lane.b32.xlu0 %v257_v1, %s2396_s9 }
  0x33   : > { %1143 = vrot.lane.b32.xlu1 %v262_v2, %s3020_s10  ;;  %1141 = vrot.lane.b32.xlu0 %v257_v1, %s3020_s10  ;;  %v2639_v1 = vrot.slane %v2537_v14, %v924_v54  ;;  %v1037_v2 = vsub.s32 7, %v2523_v9  ;;  %s2130_s10 = scalar_lea.hbm %s3019_s6, %s2274_s11 }
  0x35   : > { %v2665_v12 = vrot.slane %v2532_v13, %v1037_v2  ;;  %v2227_v13 = vld [vmem:[%s3015_s2 + $0x58] sm:$0xff] }
  0x37   : > { %1258 = vperm.xlu1 %2325, %v1254_v5   ;;  %1263 = vperm.xlu0 %2324, %v1255_v6   ;;  %v2226_v5 = vld [vmem:[%s3015_s2 + $0x50] sm:$0xff] }
  0x89   : > { %v464_v15 = vpop.permute.xlu1 %463  ;;  %v265_v16 = vpop.permute.xlu0 %264 }
  0x8d   : > { %v466_v22 = vpop.permute.xlu1 %465  ;;  %v267_v23 = vpop.permute.xlu0 %266 }
  0x8e   : > { %v468_v26 = vsel %vm467_vm2, %v464_v15, %v466_v22  ;;  %v469_v27 = vsel %vm467_vm2, %v466_v22, %v464_v15  ;;  %v271_v28 = vsel %vm270_vm3, %v265_v16, %v267_v23  ;;  %v272_v29 = vsel %vm270_vm3, %v267_v23, %v265_v16 }
  0x8f   : > { %v479_v30 = vmul.f32 %v2542_v18, %v468_v26  ;;  %v281_v31 = vmul.f32 %v2546_v19, %v272_v29  ;;  %v282_v32 = vmul.f32 %v2549_v20, %v271_v28  ;;  %v478_v34 = vmul.f32 %v2552_v21, %v469_v27  ;;  %v2695_v29 = vld [vmem:[%s3014_s1 + $0x18] ss:$0 sm:$0xff] }
  0x90   : > { %v2668_v15 = vrot.slane %v2537_v14, %v1037_v2 }
  0x91   : > { %2200 = vmatprep.subr.msk.mxu0 %vm292_vm0, %v282_v32  ;;  %v579_v36 = vpop.permute.xlu1 %578  ;;  %v577_v37 = vpop.permute.xlu0 %576 }
  0x92   : > { %2201 = vmatpush1.msk.msra.mxu0 %vm292_vm0, %v281_v31  ;;  %v581_v38 = vsel %vm580_vm4, %v577_v37, %v579_v36  ;;  %v582_v39 = vsel %vm580_vm4, %v579_v36, %v577_v37  ;;  %v2238_v31 = vld [vmem:[%s3015_s2 + $0x70] sm:$0xff] }
  0x93   : > { %v591_v40 = vmul.f32 %v2556_v24, %v582_v39  ;;  %v592_v41 = vmul.f32 %v2559_v25, %v581_v38  ;;  %2202 = vmatmul.mubr.msk.f32.vlgmr.msra.gmra.mxu0 %vm285_vm1, %v283_v35  ;;  %2210 = vmatprep.subr.msk.mxu0 %vm292_vm0, %v479_v30  ;;  %v2221_v30 = vld [vmem:[%s3015_s2 + $0x38] sm:$0xff]  ;;  %v2232_v39 = vld [vmem:[%s3015_s2 + $0x60] sm:$0xff] }
  0x94   : > { %2211 = vmatpush1.msk.msra.mxu0 %vm292_vm0, %v478_v34  ;;  %369 = vmatprep.mubr.f32.mxu0 %v2389_v0 }
  0x95   : > { %v692_v47 = vpop.permute.xlu1 %691  ;;  %v690_v48 = vpop.permute.xlu0 %689  ;;  %2216 = vmatprep.subr.msk.mxu1 %vm292_vm0, %v592_v41  ;;  %v2233_v41 = vld [vmem:[%s3015_s2 + $0x68] sm:$0xff] }
  0x96   : > { %v694_v49 = vsel %vm693_vm5, %v690_v48, %v692_v47  ;;  %v695_v50 = vsel %vm693_vm5, %v692_v47, %v690_v48  ;;  %2217 = vmatpush1.msk.msra.mxu1 %vm292_vm0, %v591_v40  ;;  %v2239_v40 = vld [vmem:[%s3015_s2 + $0x78] sm:$0xff] }
  0x97   : > { %v705_v51 = vmul.f32 %v2589_v42, %v694_v49  ;;  %2203 = vmatmul.mubr.msk.f32.gmra.mxu0 %vm285_vm1, %v284_v45  ;;  %2218 = vmatmul.mubr.msk.f32.vlgmr.msra.gmra.mxu1 %vm285_vm1, %v2214_v46  ;;  %v704_v55 = vmul.f32 %v2595_v44, %v695_v50  ;;  %v2247_v45 = vld [vmem:[%s3015_s2 + $0x88] sm:$0xff] }
  0x98   : > { %559 = vmatprep.mubr.f32.mxu0 %v2389_v0  ;;  %678 = vmatprep.mubr.f32.mxu1 %v2389_v0 }
  0x99   : > { %v805_v58 = vpop.permute.xlu1 %804  ;;  %2222 = vmatprep.subr.msk.mxu0 %vm292_vm0, %v705_v51  ;;  %v803_v59 = vpop.permute.xlu0 %802 }
  0x9a   : > { %v807_v60 = vsel %vm806_vm6, %v803_v59, %v805_v58  ;;  %v808_v61 = vsel %vm806_vm6, %v805_v58, %v803_v59 }
  0x9b   : > { %v817_v62 = vmul.f32 %v2613_v52, %v807_v60  ;;  %v818_v63 = vmul.f32 %v2616_v53, %v808_v61  ;;  %2212 = vmatmul.mubr.msk.f32.vlgmr.msra.gmra.mxu0 %vm285_vm1, %v2208_v56  ;;  %2219 = vmatmul.mubr.msk.f32.gmra.mxu1 %vm285_vm1, %v2215_v57 }
  0x9c   : > { %2223 = vmatpush1.msk.msra.mxu0 %vm292_vm0, %v704_v55  ;;  %565 = vmatprep.mubr.f32.mxu0 %v2389_v0 }
  0x9d   : > { %v918_v6 = vpop.permute.xlu1 %917  ;;  %v916_v7 = vpop.permute.xlu0 %915  ;;  %2228 = vmatprep.subr.msk.mxu1 %vm292_vm0, %v818_v63  ;;  %898 = vmatprep.mubr.f32.mxu1 %v2389_v0 }
  0x9e   : > { %v920_v8 = vsel %vm919_vm7, %v916_v7, %v918_v6  ;;  %v921_v9 = vsel %vm919_vm7, %v918_v6, %v916_v7  ;;  %2229 = vmatpush1.msk.msra.mxu1 %vm292_vm0, %v817_v62 }
  0x9f   : > { %v931_v11 = vmul.f32 %v2639_v1, %v921_v9  ;;  %2213 = vmatmul.mubr.msk.f32.gmra.mxu0 %vm285_vm1, %v2209_v4  ;;  %2230 = vmatmul.mubr.msk.f32.vlgmr.msra.gmra.mxu1 %vm285_vm1, %v2226_v5  ;;  %v930_v16 = vmul.f32 %v2646_v3, %v920_v8 }
  0xa0   : > { %785 = vmatprep.mubr.f32.mxu0 %v2389_v0  ;;  %904 = vmatprep.mubr.f32.mxu1 %v2389_v0 }
  0xa1   : > { %v1031_v22 = vpop.permute.xlu1 %1030  ;;  %2234 = vmatprep.subr.msk.mxu0 %vm292_vm0, %v931_v11  ;;  %v1029_v14 = vpop.permute.xlu0 %1028 }
  0xa2   : > { %v1033_v23 = vsel %vm1032_vm8, %v1029_v14, %v1031_v22  ;;  %v1034_v26 = vsel %vm1032_vm8, %v1031_v22, %v1029_v14 }
  0xa3   : > { %v1043_v27 = vmul.f32 %v2665_v12, %v1033_v23  ;;  %v1044_v28 = vmul.f32 %v2668_v15, %v1034_v26  ;;  %2224 = vmatmul.mubr.msk.f32.vlgmr.msra.gmra.mxu0 %vm285_vm1, %v2220_v17  ;;  %2231 = vmatmul.mubr.msk.f32.gmra.mxu1 %vm285_vm1, %v2227_v13 }
  0xa4   : > { %2235 = vmatpush1.msk.msra.mxu0 %vm292_vm0, %v930_v16  ;;  %791 = vmatprep.mubr.f32.mxu0 %v2389_v0 }
  0xa5   : > { %v1144_v32 = vpop.permute.xlu1 %1143  ;;  %v1142_v34 = vpop.permute.xlu0 %1141  ;;  %2240 = vmatprep.subr.msk.mxu1 %vm292_vm0, %v1044_v28  ;;  %1124 = vmatprep.mubr.f32.mxu1 %v2389_v0 }
  0xa6   : > { %v1146_v35 = vsel %vm1145_vm9, %v1142_v34, %v1144_v32  ;;  %v1147_v36 = vsel %vm1145_vm9, %v1144_v32, %v1142_v34  ;;  %2241 = vmatpush1.msk.msra.mxu1 %vm292_vm0, %v1043_v27 }
  0xa7   : > { %v1157_v37 = vmul.f32 %v2695_v29, %v1147_v36  ;;  %2225 = vmatmul.mubr.msk.f32.gmra.mxu0 %vm285_vm1, %v2221_v30  ;;  %2242 = vmatmul.mubr.msk.f32.vlgmr.msra.gmra.mxu1 %vm285_vm1, %v2238_v31  ;;  %v1156_v38 = vmul.f32 %v2706_v33, %v1146_v35 }
  0xa8   : > { %1011 = vmatprep.mubr.f32.mxu0 %v2389_v0  ;;  %1130 = vmatprep.mubr.f32.mxu1 %v2389_v0 }
  0xa9   : > { %2248 = vmatprep.subr.msk.mxu0 %vm292_vm0, %v1157_v37 }
  0xab   : > { %2236 = vmatmul.mubr.msk.f32.vlgmr.msra.gmra.mxu0 %vm285_vm1, %v2232_v39  ;;  %2243 = vmatmul.mubr.msk.f32.gmra.mxu1 %vm285_vm1, %v2239_v40 }
  0xac   : > { %2249 = vmatpush1.msk.msra.mxu0 %vm292_vm0, %v1156_v38  ;;  %1017 = vmatprep.mubr.f32.mxu0 %v2389_v0 }
  0xad   : > { %1365 = vmatprep.mubr.f32.mxu1 %v2389_v0 }
  0xaf   : > { %2237 = vmatmul.mubr.msk.f32.gmra.mxu0 %vm285_vm1, %v2233_v41 }
  0xb0   : > { %1237 = vmatprep.mubr.f32.mxu0 %v2389_v0 }
  0xb3   : > { %2250 = vmatmul.mubr.msk.f32.vlgmr.msra.gmra.mxu0 %vm285_vm1, %v2246_v43  ;;  %v1259_v43 = vpop.permute.xlu1 %1258 }
  0xb4   : > { %1243 = vmatprep.mubr.f32.mxu0 %v2389_v0 }
  0xb7   : > { %2251 = vmatmul.mubr.msk.f32.gmra.mxu0 %vm285_vm1, %v2247_v45 }
  0xb8   : > { %1531 = vmatprep.mubr.f32.mxu0 %v2389_v0 }
  0xdc   : > { %v452_v46 = vpop.f32.mrf.mxu1 }
  0xde   : > { %v454_v47 = vpop.f32.mrf.mxu1 }
  0xe0   : > { %v458_v48 = vpop.f32.mrf.mxu1 }
  0xe2   : > { %v460_v51 = vpop.f32.mrf.mxu1 }
 0x153   : > { %v365_v49 = vpop.f32.mrf.mxu0 }
 0x154   : > { %v453_v2 = vadd.f32 %v452_v46, %v365_v49 }
 0x155   : > { %v367_v50 = vpop.f32.mrf.mxu0 }
 0x156   : > { %v455_v6 = vadd.f32 %v454_v47, %v367_v50 }
 0x157   : > { %v371_v54 = vpop.f32.mrf.mxu0  ;;  %v674_v55 = vpop.f32.mrf.mxu1 }
 0x158   : > { %v459_v49 = vadd.f32 %v458_v48, %v371_v54 }
 0x159   : > { %v373_v56 = vpop.f32.mrf.mxu0  ;;  %v676_v57 = vpop.f32.mrf.mxu1 }
 0x15b   : > { %v561_v58 = vpop.f32.mrf.mxu0  ;;  %v680_v59 = vpop.f32.mrf.mxu1 }
 0x15c   : > { %v572_v7 = vadd.f32 %v561_v58, %v453_v2 }
 0x15d   : > { %v563_v60 = vpop.f32.mrf.mxu0  ;;  %v682_v61 = vpop.f32.mrf.mxu1 }
 0x15e   : > { %v573_v9 = vadd.f32 %v563_v60, %v455_v6  ;;  %v685_v17 = vadd.f32 %v674_v55, %v572_v7 }
 0x15f   : > { %v567_v62 = vpop.f32.mrf.mxu0  ;;  %v900_v63 = vpop.f32.mrf.mxu1 }
 0x160   : > { %v686_v22 = vadd.f32 %v676_v57, %v573_v9  ;;  %v461_v57 = vadd.f32 %v460_v51, %v373_v56  ;;  %v574_v58 = vadd.f32 %v567_v62, %v459_v49 }
 0x161   : > { %v569_v4 = vpop.f32.mrf.mxu0  ;;  %v902_v5 = vpop.f32.mrf.mxu1 }
 0x162   : > { %v575_v2 = vadd.f32 %v569_v4, %v461_v57  ;;  %v687_v7 = vadd.f32 %v680_v59, %v574_v58 }
 0x163   : > { %v787_v8 = vpop.f32.mrf.mxu0  ;;  %v906_v16 = vpop.f32.mrf.mxu1 }
 0x164   : > { %v798_v14 = vadd.f32 %v787_v8, %v685_v17  ;;  %v688_v9 = vadd.f32 %v682_v61, %v575_v2 }
 0x165   : > { %v789_v11 = vpop.f32.mrf.mxu0  ;;  %v908_v26 = vpop.f32.mrf.mxu1 }
 0x166   : > { %v799_v27 = vadd.f32 %v789_v11, %v686_v22  ;;  %v911_v30 = vadd.f32 %v900_v63, %v798_v14  ;;  %v1264_v14 = vpop.permute.xlu0 %1263 }
 0x167   : > { %v793_v13 = vpop.f32.mrf.mxu0  ;;  %v1126_v32 = vpop.f32.mrf.mxu1 }
 0x168   : > { %v912_v34 = vadd.f32 %v902_v5, %v799_v27  ;;  %v800_v11 = vadd.f32 %v793_v13, %v687_v7 }
 0x169   : > { %v795_v23 = vpop.f32.mrf.mxu0  ;;  %v1128_v38 = vpop.f32.mrf.mxu1 }
 0x16a   : > { %v801_v48 = vadd.f32 %v795_v23, %v688_v9  ;;  %v913_v51 = vadd.f32 %v906_v16, %v800_v11 }
 0x16b   : > { %v1013_v28 = vpop.f32.mrf.mxu0  ;;  %v1132_v54 = vpop.f32.mrf.mxu1 }
 0x16c   : > { %v1024_v35 = vadd.f32 %v1013_v28, %v911_v30  ;;  %v914_v56 = vadd.f32 %v908_v26, %v801_v48 }
 0x16d   : > { %v1015_v31 = vpop.f32.mrf.mxu0  ;;  %v1134_v4 = vpop.f32.mrf.mxu1 }
 0x16e   : > { %v1025_v37 = vadd.f32 %v1015_v31, %v912_v34  ;;  %v1137_v40 = vadd.f32 %v1126_v32, %v1024_v35  ;;  %v2104_v34 = vld [vmem:[%s3018_s5] sm:$0x7] }
 0x16f   : > { %v1019_v36 = vpop.f32.mrf.mxu0 }
 0x170   : > { %v1138_v45 = vadd.f32 %v1128_v38, %v1025_v37  ;;  %v1026_v59 = vadd.f32 %v1019_v36, %v913_v51 }
 0x171   : > { %v1021_v39 = vpop.f32.mrf.mxu0 }
 0x172   : > { %v1027_v61 = vadd.f32 %v1021_v39, %v914_v56  ;;  %v1139_v17 = vadd.f32 %v1132_v54, %v1026_v59 }
 0x173   : > { %v1239_v41 = vpop.f32.mrf.mxu0 }
 0x174   : > { %v1250_v46 = vadd.f32 %v1239_v41, %v1137_v40  ;;  %v1140_v13 = vadd.f32 %v1134_v4, %v1027_v61 }
 0x175   : > { %v1241_v47 = vpop.f32.mrf.mxu0 }
 0x176   : > { %v1266_v50 = vadd.f32 %v1259_v43, %v1250_v46  ;;  %v1251_v55 = vadd.f32 %v1241_v47, %v1138_v45 }
 0x177   : > { %v1245_v62 = vpop.f32.mrf.mxu0 }
 0x178   : > { %v1270_v60 = vmul.f32 0.01, %v1266_v50  ;;  %v1267_v63 = vadd.f32 %v1259_v43, %v1251_v55  ;;  %v1252_v22 = vadd.f32 %v1245_v62, %v1139_v17  ;;  %v1296_v17 = vld [vmem:[%s3017_s4] sm:$0x7] }
 0x179   : > { %v1247_v16 = vpop.f32.mrf.mxu0 }
 0x17a   : > { %v2748_v5 = vmax.f32 %v1266_v50, %v1270_v60  ;;  %v1271_v6 = vmul.f32 0.01, %v1267_v63  ;;  %v1253_v23 = vadd.f32 %v1247_v16, %v1140_v13  ;;  %v1268_v26 = vadd.f32 %v1264_v14, %v1252_v22 }
 0x17c   : > { %v2750_v8 = vmax.f32 %v1267_v63, %v1271_v6  ;;  %1280 = vrot.lane.b32.xlu1 %v2748_v5, %s2391_s15  ;;  %v1269_v27 = vadd.f32 %v1264_v14, %v1253_v23  ;;  %v1272_v28 = vmul.f32 0.01, %v1268_v26 }
 0x17e   : > { %1284 = vrot.lane.b32.xlu0 %v2750_v8, %s2391_s15  ;;  %v1273_v30 = vmul.f32 0.01, %v1269_v27  ;;  %v2778_v31 = vmax.f32 %v1268_v26, %v1272_v28  ;;  %v2252_v28 = vld [vmem:[%s3017_s4 + $0x10] sm:$0x7] }
 0x180   : > { %1446 = vrot.lane.b32.xlu1 %v2748_v5, %s2390_s14  ;;  %v1277_v32 = vmax.f32 %v1269_v27, %v1273_v30 }
 0x182   : > { %1450 = vrot.lane.b32.xlu0 %v2750_v8, %s2390_s14 }
 0x184   : > { %1540 = vrot.lane.b32.xlu1 %v2748_v5, %s2392_s20 }
 0x186   : > { %1544 = vrot.lane.b32.xlu0 %v2750_v8, %s2392_s20 }
 0x188   : > { %1634 = vrot.lane.b32.xlu1 %v2748_v5, %s2393_s26 }
 0x18a   : > { %1638 = vrot.lane.b32.xlu0 %v2750_v8, %s2393_s26 }
 0x18c   : > { %1728 = vrot.lane.b32.xlu1 %v2748_v5, %s2394_s28 }
 0x18e   : > { %1732 = vrot.lane.b32.xlu0 %v2750_v8, %s2394_s28 }
 0x190   : > { %1822 = vrot.lane.b32.xlu1 %v2748_v5, %s2395_s29 }
 0x192   : > { %1826 = vrot.lane.b32.xlu0 %v2750_v8, %s2395_s29 }
 0x194   : > { %1916 = vrot.lane.b32.xlu1 %v2748_v5, %s2396_s9 }
 0x196   : > { %1920 = vrot.lane.b32.xlu0 %v2750_v8, %s2396_s9 }
 0x198   : > { %1282 = vrot.lane.b32.xlu1 %v2778_v31, %s2391_s15 }
 0x19a   : > { %1286 = vrot.lane.b32.xlu0 %v1277_v32, %s2391_s15  ;;  %s2399_s15 = smov [#allocation2]  }
 0x19c   : > { %1448 = vrot.lane.b32.xlu1 %v2778_v31, %s2390_s14 }
 0x19e   : > { %1452 = vrot.lane.b32.xlu0 %v1277_v32, %s2390_s14  ;;  %s3024_s14 = smov 111  }
 0x1a0   : > { %1542 = vrot.lane.b32.xlu1 %v2778_v31, %s2392_s20 }
 0x1a2   : > { %1546 = vrot.lane.b32.xlu0 %v1277_v32, %s2392_s20  ;;  %s2331_s20 = sshll.u32 %s2399_s15, 4  ;;  %s2332_s20 = int_to_ptr.vmem [resolvable:$false] %s2331_s20 }
 0x1a3   : > { %s2333_s25 = scalar_lea.vmem %s2332_s20, 256 }
 0x1a4   : > { %1636 = vrot.lane.b32.xlu1 %v2778_v31, %s2393_s26 }
 0x1a6   : > { %1640 = vrot.lane.b32.xlu0 %v1277_v32, %s2393_s26 }
 0x1a8   : > { %1730 = vrot.lane.b32.xlu1 %v2778_v31, %s2394_s28 }
 0x1aa   : > { %1734 = vrot.lane.b32.xlu0 %v1277_v32, %s2394_s28 }
 0x1ac   : > { %1824 = vrot.lane.b32.xlu1 %v2778_v31, %s2395_s29 }
 0x1ae   : > { %1828 = vrot.lane.b32.xlu0 %v1277_v32, %s2395_s29 }
 0x1b0   : > { %1918 = vrot.lane.b32.xlu1 %v2778_v31, %s2396_s9 }
 0x1b2   : > { %1922 = vrot.lane.b32.xlu0 %v1277_v32, %s2396_s9  ;;  %s243_s9 = sand.u32 1, %s2379_s22  }
 0x1b3   : > { %s2195_s19 = sshll.u32 %s243_s9, 3  ;;  %s2118_s18 = scalar_lea.sflag [#allocation3], %s243_s9 }
 0x1b4   : > { %2012 = vrot.lane.b32.xlu1 %v2778_v31, %s3024_s14  ;;  %s245_s12 = scalar_lea.vmem [#allocation2], %s2195_s19 }
 0x1b5   : > { %s2132_s13 = sshll.u32 %s245_s12, 4  ;;  %s2133_s13 = int_to_ptr.vmem [resolvable:$true] %s2132_s13 }
 0x1b6   : > { %2016 = vrot.lane.b32.xlu0 %v1277_v32, %s3024_s14  ;;  %p2334_p0 = scmp.lt.s32.totalorder %s2133_s13, %s2332_s20 }
 0x1b8   : > { %2010 = vrot.lane.b32.xlu1 %v2748_v5, %s3024_s14 }
 0x1ba   : > { %2014 = vrot.lane.b32.xlu0 %v2750_v8, %s3024_s14  ;;  %s2327_s14 = scalar_lea.vmem %s2133_s13, 128 }
 0x1bb   : > { %p2328_p11 = scmp.ne.s32.totalorder %s2133_s13, %s2327_s14  ;;  %p2335_p1 = scmp.lt.s32.totalorder %s2333_s25, %s2327_s14 }
 0x1bc   : > { %2107 = vperm.xlu1 %2325, %v2104_v34  }
 0x1bd   : > { %p2329_p12 = pnand %p2328_p11, %p2473_p5  ;;  %p2336_p2 = por %p2335_p1, %p2334_p0 }
 0x1bf   : > { %p2330_p13 = pneg %p2329_p12 }
 0x1c1   : > { %p2337_p3 = pnand %p2336_p2, %p2330_p13 }
 0x1ee   : > { %v1281_v35 = vpop.permute.xlu1 %1280 }
 0x1f0   : > { %v1285_v36 = vpop.permute.xlu0 %1284 }
 0x1f1   : > { %v1288_v60 = vsel %vm270_vm3, %v1281_v35, %v1285_v36  ;;  %v1290_v63 = vsel %vm270_vm3, %v1285_v36, %v1281_v35 }
 0x1f2   : > { %v1447_v37 = vpop.permute.xlu1 %1446  ;;  %v1292_v48 = vmul.f32 %v1290_v63, %v2546_v19  ;;  %v1293_v51 = vmul.f32 %v1288_v60, %v2549_v20 }
 0x1f4   : > { %v1451_v38 = vpop.permute.xlu0 %1450 }
 0x1f5   : > { %v1454_v56 = vsel %vm467_vm2, %v1447_v37, %v1451_v38  ;;  %v1456_v59 = vsel %vm467_vm2, %v1451_v38, %v1447_v37 }
 0x1f6   : > { %v1541_v39 = vpop.permute.xlu1 %1540  ;;  %v1458_v16 = vmul.f32 %v1456_v59, %v2552_v21  ;;  %v1459_v13 = vmul.f32 %v1454_v56, %v2542_v18 }
 0x1f8   : > { %v1545_v40 = vpop.permute.xlu0 %1544 }
 0x1f9   : > { %v1548_v14 = vsel %vm580_vm4, %v1541_v39, %v1545_v40  ;;  %v1550_v30 = vsel %vm580_vm4, %v1545_v40, %v1541_v39  ;;  %v2257_v40 = vld [vmem:[%s3017_s4 + $0x8] sm:$0x7] }
 0x1fa   : > { %v1635_v41 = vpop.permute.xlu1 %1634  ;;  %v1553_v34 = vmul.f32 %v1548_v14, %v2559_v25 }
 0x1fc   : > { %v1639_v43 = vpop.permute.xlu0 %1638 }
 0x1fd   : > { %v1644_v36 = vsel %vm693_vm5, %v1639_v43, %v1635_v41 }
 0x1fe   : > { %v2813_v45 = vpop.permute.xlu1 %1728 }
 0x200   : > { %v2815_v46 = vpop.permute.xlu0 %1732 }
 0x202   : > { %v2817_v47 = vpop.permute.xlu1 %1822 }
 0x204   : > { %v2819_v49 = vpop.permute.xlu0 %1826 }
 0x206   : > { %v2821_v50 = vpop.permute.xlu1 %1916 }
 0x208   : > { %v2823_v55 = vpop.permute.xlu0 %1920 }
 0x20a   : > { %v1283_v57 = vpop.permute.xlu1 %1282 }
 0x20c   : > { %v1287_v58 = vpop.permute.xlu0 %1286 }
 0x20d   : > { %v1289_v2 = vsel %vm270_vm3, %v1283_v57, %v1287_v58  ;;  %v1291_v6 = vsel %vm270_vm3, %v1287_v58, %v1283_v57  ;;  %v1738_v58 = vsel %vm806_vm6, %v2815_v46, %v2813_v45 }
 0x20e   : > { %v1294_v7 = vmul.f32 %v1291_v6, %v2546_v19  ;;  %v1295_v9 = vmul.f32 %v1289_v2, %v2549_v20  ;;  %v1449_v11 = vpop.permute.xlu1 %1448 }
 0x210   : > { %v1453_v54 = vpop.permute.xlu0 %1452  ;;  %1329 = vmatprep.subr.mxu1 %v1295_v9 }
 0x211   : > { %v1455_v62 = vsel %vm467_vm2, %v1449_v11, %v1453_v54  ;;  %v1457_v61 = vsel %vm467_vm2, %v1453_v54, %v1449_v11  ;;  %1330 = vmatpush1.msra.mxu1 %v1294_v7  ;;  %v1830_v7 = vsel %vm919_vm7, %v2817_v47, %v2819_v49  ;;  %v1832_v11 = vsel %vm919_vm7, %v2819_v49, %v2817_v47 }
 0x212   : > { %v1460_v4 = vmul.f32 %v1457_v61, %v2552_v21  ;;  %v1461_v19 = vmul.f32 %v1455_v62, %v2542_v18  ;;  %1331 = vmatprep.subr.mxu1 %v1293_v51  ;;  %v1543_v20 = vpop.permute.xlu1 %1542  ;;  %v1834_v47 = vmul.f32 %v1830_v7, %v2646_v3  ;;  %v1835_v49 = vmul.f32 %v1832_v11, %v2639_v1 }
 0x213   : > { %1332 = vmatpush1.msra.mxu1 %v1292_v48  ;;  %v1926_v62 = vsel %vm1032_vm8, %v2823_v55, %v2821_v50 }
 0x214   : > { %v1547_v22 = vpop.permute.xlu0 %1546  ;;  %1403 = vmatprep.subr.mxu1 %v1277_v32  ;;  %1495 = vmatprep.subr.mxu0 %v1461_v19  ;;  %v2255_v32 = vld [vmem:[%s3017_s4 + $0x4] sm:$0x7] }
 0x215   : > { %v1549_v23 = vsel %vm580_vm4, %v1543_v20, %v1547_v22  ;;  %v1551_v26 = vsel %vm580_vm4, %v1547_v22, %v1543_v20  ;;  %2253 = vmatmul.mubr.msk.f32.vlgmr.msra.gmra.mxu1 %vm1297_vm10, %v1296_v17  ;;  %1496 = vmatpush1.msra.mxu0 %v1460_v4 }
 0x216   : > { %v1554_v27 = vmul.f32 %v1551_v26, %v2556_v24  ;;  %v1555_v21 = vmul.f32 %v1549_v23, %v2559_v25  ;;  %1404 = vmatpush1.msra.mxu1 %v2778_v31  ;;  %1497 = vmatprep.subr.mxu0 %v1459_v13  ;;  %v1637_v18 = vpop.permute.xlu1 %1636  ;;  %v1642_v31 = vsel %vm693_vm5, %v1635_v41, %v1639_v43 }
 0x217   : > { %1405 = vmatprep.subr.mxu1 %v2750_v8  ;;  %1498 = vmatpush1.msra.mxu0 %v1458_v16  ;;  %v1552_v25 = vmul.f32 %v1550_v30, %v2556_v24  ;;  %v1646_v41 = vmul.f32 %v1644_v36, %v2595_v44  ;;  %v1647_v43 = vmul.f32 %v1642_v31, %v2589_v42 }
 0x218   : > { %1406 = vmatpush1.msra.mxu1 %v2748_v5  ;;  %v1641_v35 = vpop.permute.xlu0 %1640  ;;  %1439 = vmatprep.mubr.f32.mxu1 %v2389_v0  ;;  %v1736_v24 = vsel %vm806_vm6, %v2813_v45, %v2815_v46  ;;  %v1741_v46 = vmul.f32 %v1738_v58, %v2616_v53  ;;  %v1929_v16 = vmul.f32 %v1926_v62, %v2668_v15 }
 0x219   : > { %v1643_v8 = vsel %vm693_vm5, %v1637_v18, %v1641_v35  ;;  %v1645_v37 = vsel %vm693_vm5, %v1641_v35, %v1637_v18  ;;  %1589 = vmatprep.subr.mxu1 %v1555_v21  ;;  %2254 = vmatmul.mubr.msk.f32.vlgmr.msra.gmra.mxu1 %vm1297_vm10, %v2252_v28  ;;  %v1740_v45 = vmul.f32 %v1736_v24, %v2613_v52  ;;  %v2267_v28 = vld [vmem:[%s3017_s4 + $0x20] sm:$0x7] }
 0x21a   : > { %v1648_v38 = vmul.f32 %v1645_v37, %v2595_v44  ;;  %v1649_v5 = vmul.f32 %v1643_v8, %v2589_v42  ;;  %1590 = vmatpush1.msra.mxu1 %v1554_v27  ;;  %v1731_v39 = vpop.permute.xlu1 %1730  ;;  %2256 = vmatmul.mubr.msk.f32.vlgmr.msra.gmra.mxu0 %vm1297_vm10, %v2255_v32  ;;  %v2259_v42 = vld [vmem:[%s3017_s4 + $0xc] sm:$0x7] }
 0x21b   : > { %1591 = vmatprep.subr.mxu1 %v1553_v34  ;;  %1625 = vmatprep.mubr.f32.mxu1 %v2389_v0 }
 0x21c   : > { %1592 = vmatpush1.msra.mxu1 %v1552_v25  ;;  %v1735_v57 = vpop.permute.xlu0 %1734  ;;  %1683 = vmatprep.subr.mxu0 %v1649_v5 }
 0x21d   : > { %v1737_v60 = vsel %vm806_vm6, %v1731_v39, %v1735_v57  ;;  %v1739_v44 = vsel %vm806_vm6, %v1735_v57, %v1731_v39  ;;  %1684 = vmatpush1.msra.mxu0 %v1648_v38  ;;  %2258 = vmatmul.mubr.msk.f32.vlgmr.msra.gmra.mxu1 %vm1297_vm10, %v2257_v40 }
 0x21e   : > { %v1742_v63 = vmul.f32 %v1737_v60, %v2613_v52  ;;  %v1743_v2 = vmul.f32 %v1739_v44, %v2616_v53  ;;  %1685 = vmatprep.subr.mxu0 %v1647_v43  ;;  %v1825_v6 = vpop.permute.xlu1 %1824  ;;  %1719 = vmatprep.mubr.f32.mxu0 %v2389_v0  ;;  %v2261_v53 = vld [vmem:[%s3017_s4 + $0x14] sm:$0x7] }
 0x21f   : > { %1686 = vmatpush1.msra.mxu0 %v1646_v41  ;;  %1813 = vmatprep.mubr.f32.mxu1 %v2389_v0 }
 0x220   : > { %v1829_v9 = vpop.permute.xlu0 %1828  ;;  %1777 = vmatprep.subr.mxu1 %v1743_v2  ;;  %2260 = vmatmul.mubr.msk.f32.vlgmr.msra.gmra.mxu0 %vm1297_vm10, %v2259_v42 }
 0x221   : > { %v1831_v48 = vsel %vm919_vm7, %v1825_v6, %v1829_v9  ;;  %v1833_v52 = vsel %vm919_vm7, %v1829_v9, %v1825_v6  ;;  %1778 = vmatpush1.msra.mxu1 %v1742_v63  ;;  %1907 = vmatprep.mubr.f32.mxu0 %v2389_v0 }
 0x222   : > { %v1836_v51 = vmul.f32 %v1831_v48, %v2646_v3  ;;  %v1837_v54 = vmul.f32 %v1833_v52, %v2639_v1  ;;  %1779 = vmatprep.subr.mxu1 %v1741_v46  ;;  %v1919_v56 = vpop.permute.xlu1 %1918  ;;  %v2263_v1 = vld [vmem:[%s3017_s4 + $0x18] sm:$0x7]  ;;  %v1924_v3 = vsel %vm1032_vm8, %v2821_v50, %v2823_v55  ;;  %v2265_v55 = vld [vmem:[%s3017_s4 + $0x1c] sm:$0x7] }
 0x223   : > { %1780 = vmatpush1.msra.mxu1 %v1740_v45  ;;  %v1928_v22 = vmul.f32 %v1924_v3, %v2665_v12 }
 0x224   : > { %v1923_v59 = vpop.permute.xlu0 %1922  ;;  %1871 = vmatprep.subr.mxu0 %v1837_v54  ;;  %2262 = vmatmul.mubr.msk.f32.vlgmr.msra.gmra.mxu1 %vm1297_vm10, %v2261_v53 }
 0x225   : > { %v1925_v61 = vsel %vm1032_vm8, %v1919_v56, %v1923_v59  ;;  %v1927_v4 = vsel %vm1032_vm8, %v1923_v59, %v1919_v56  ;;  %1872 = vmatpush1.msra.mxu0 %v1836_v51  ;;  %2001 = vmatprep.mubr.f32.mxu1 %v2389_v0 }
 0x226   : > { %v1930_v19 = vmul.f32 %v1925_v61, %v2665_v12  ;;  %v1931_v20 = vmul.f32 %v1927_v4, %v2668_v15  ;;  %1873 = vmatprep.subr.mxu0 %v1835_v49  ;;  %v2013_v17 = vpop.permute.xlu1 %2012 }
 0x227   : > { %1874 = vmatpush1.msra.mxu0 %v1834_v47 }
 0x228   : > { %v2017_v13 = vpop.permute.xlu0 %2016  ;;  %1965 = vmatprep.subr.mxu1 %v1931_v20  ;;  %2264 = vmatmul.mubr.msk.f32.vlgmr.msra.gmra.mxu0 %vm1297_vm10, %v2263_v1 }
 0x229   : > { %v2019_v14 = vsel %vm1145_vm9, %v2013_v17, %v2017_v13  ;;  %v2021_v50 = vsel %vm1145_vm9, %v2017_v13, %v2013_v17  ;;  %1966 = vmatpush1.msra.mxu1 %v1930_v19  ;;  %2095 = vmatprep.mubr.f32.mxu0 %v2389_v0 }
 0x22a   : > { %v2024_v15 = vmul.f32 %v2706_v33, %v2019_v14  ;;  %v2025_v23 = vmul.f32 %v2695_v29, %v2021_v50  ;;  %1967 = vmatprep.subr.mxu1 %v1929_v16  ;;  %v2011_v12 = vpop.permute.xlu1 %2010 }
 0x22b   : > { %1968 = vmatpush1.msra.mxu1 %v1928_v22 }
 0x22c   : > { %v2015_v26 = vpop.permute.xlu0 %2014  ;;  %2266 = vmatmul.mubr.msk.f32.vlgmr.msra.gmra.mxu1 %vm1297_vm10, %v2265_v55  ;;  %2059 = vmatprep.subr.mxu0 %v2025_v23 }
 0x22d   : > { %v2018_v27 = vsel %vm1145_vm9, %v2011_v12, %v2015_v26  ;;  %v2020_v21 = vsel %vm1145_vm9, %v2015_v26, %v2011_v12  ;;  %2060 = vmatpush1.msra.mxu0 %v2024_v15 }
 0x22e   : > { %v2022_v0 = vmul.f32 %v2706_v33, %v2018_v27  ;;  %v2023_v18 = vmul.f32 %v2695_v29, %v2020_v21 }
 0x230   : > { %2061 = vmatprep.subr.mxu0 %v2023_v18 }
 0x231   : > { %2062 = vmatpush1.msra.mxu0 %v2022_v0 }
 0x232   : > { %2268 = vmatmul.mubr.msk.f32.vlgmr.msra.gmra.mxu0 %vm1297_vm10, %v2267_v28 }
 0x237   : > { %v2108_v53 = vpop.permute.xlu1 %2107 }
 0x2d5   : > { %v1367_v30 = vpop.f32.mrf.mxu1 }
 0x2d7   : > { %v1369_v32 = vpop.f32.mrf.mxu1 }
 0x2d9   : > { %v1441_v34 = vpop.f32.mrf.mxu1 }
 0x2da   : > { %v1442_v31 = vadd.f32 %v1441_v34, %v1367_v30  ;;  %v1533_v35 = vpop.f32.mrf.mxu0 }
 0x2db   : > { %v1443_v10 = vpop.f32.mrf.mxu1 }
 0x2dc   : > { %v1444_v36 = vadd.f32 %v1443_v10, %v1369_v32  ;;  %v1538_v8 = vadd.f32 %v1533_v35, %v1442_v31  ;;  %v1535_v37 = vpop.f32.mrf.mxu0 }
 0x2dd   : > { %v1627_v33 = vpop.f32.mrf.mxu1 }
 0x2de   : > { %v1539_v29 = vadd.f32 %v1535_v37, %v1444_v36  ;;  %v1632_v25 = vadd.f32 %v1627_v33, %v1538_v8 }
 0x2df   : > { %v1629_v38 = vpop.f32.mrf.mxu1 }
 0x2e0   : > { %v1721_v5 = vpop.f32.mrf.mxu0  ;;  %v1633_v39 = vadd.f32 %v1629_v38, %v1539_v29 }
 0x2e1   : > { %v1726_v40 = vadd.f32 %v1721_v5, %v1632_v25 }
 0x2e2   : > { %v1723_v41 = vpop.f32.mrf.mxu0 }
 0x2e3   : > { %v1727_v24 = vadd.f32 %v1723_v41, %v1633_v39 }
 0x2e4   : > { %v1815_v43 = vpop.f32.mrf.mxu1 }
 0x2e5   : > { %v1820_v57 = vadd.f32 %v1815_v43, %v1726_v40 }
 0x2e6   : > { %v1817_v58 = vpop.f32.mrf.mxu1 }
 0x2e7   : > { %v1821_v42 = vadd.f32 %v1817_v58, %v1727_v24 }
 0x2e8   : > { %v1909_v60 = vpop.f32.mrf.mxu0 }
 0x2e9   : > { %v1914_v63 = vadd.f32 %v1909_v60, %v1820_v57 }
 0x2ea   : > { %v1911_v2 = vpop.f32.mrf.mxu0 }
 0x2eb   : > { %v1915_v45 = vadd.f32 %v1911_v2, %v1821_v42 }
 0x2ec   : > { %v2003_v44 = vpop.f32.mrf.mxu1 }
 0x2ed   : > { %v2008_v46 = vadd.f32 %v2003_v44, %v1914_v63 }
 0x2ee   : > { %v2005_v6 = vpop.f32.mrf.mxu1 }
 0x2ef   : > { %v2009_v9 = vadd.f32 %v2005_v6, %v1915_v45 }
 0x2f2   : > { %v2097_v7 = vpop.f32.mrf.mxu0 }
 0x2f3   : > { %v2102_v11 = vadd.f32 %v2097_v7, %v2008_v46 }
 0x2f4   : > { %v2099_v48 = vpop.f32.mrf.mxu0 }
 0x2f5   : > { %v2103_v52 = vadd.f32 %v2099_v48, %v2009_v9  ;;  %v2110_v51 = vadd.f32 %v2108_v53, %v2102_v11 }
 0x2f7   : > { %v2111_v54 = vadd.f32 %v2108_v53, %v2103_v52 }
 0x2f9   : > { %v2114_v56 = vcombine.low %v2110_v51, %v2111_v54 }
 0x2fb   : > { %2116 = vst [vmem:[%s245_s12] sm:$0x77] %v2114_v56 }
 0x2fc   : > { %2340 = shalt.err (!%p2337_p3)
}
 0x2fd   : > { %s2341_s26 = scalar_lea.hbm %s2130_s10, 128  ;;  %s2345_s9 = scalar_lea.hbm %s3019_s6, 256 }
 0x2fe   : > { %p2342_p4 = scmp.ne.s32.totalorder %s2130_s10, %s2341_s26  ;;  %p2346_p9 = scmp.lt.s32.totalorder %s2130_s10, %s3019_s6 }
 0x2ff   : > { %p2347_p10 = scmp.lt.s32.totalorder %s2345_s9, %s2341_s26 }
 0x300   : > { %p2343_p7 = pnand %p2342_p4, %p2473_p5 }
 0x301   : > { %p2348_p11 = por %p2347_p10, %p2346_p9 }
 0x302   : > { %p2344_p8 = pneg %p2343_p7 }
 0x304   : > { %p2349_p12 = pnand %p2348_p11, %p2344_p8 }
 0x306   : > { %2352 = shalt.err (!%p2349_p12)
}
 0x307   : > { %2275 = dma.vmem_to_hbm [thread:$0]  (%p2473_p5), %s2133_s13, 128, %s2130_s10, %s2118_s18  }
 0x308 PF: > { %p2281_p13 = scmp.ge.s32.totalorder %s2387_s24, 2  ;;  %s2144_s12 = sand.u32 1, %s2375_s21  }
 0x309   : > { %s2145_s16 = scalar_lea.sflag [#allocation3], %s2144_s12 }
 0x30a   : > { %p2278_p0 = pnand %p2281_p13, %p2477_p6 }
 0x30c   : > { %p2279_p1 = pneg %p2278_p0 }
 0x30e   : > { %2370 = dma.done.wait (%p2279_p1), %s2145_s16, 128  }
 0x30f   : > { %2372 = vsyncadd (%p2279_p1), %s2145_s16, 4294967168  ;;  %p16_p2 = scmp.ge.s32.totalorder %s2460_s27, 4   ;;  %s3025_s21 = smov %s2379_s22 }
 0x310   : > { %s3026_s22 = smov %s2383_s23  ;;  %s3027_s23 = smov %s2471_s30 }
 0x311   : > { %s3028_s24 = smov %s2460_s27  ;;  %18 = sbr.rel (!%p16_p2) target bundleno = 3 (0x3), region = 95 }
 0x316   :  { %2150 = vsyncpa [#allocation3], 1 }
 0x317   :  { %2152 = vsyncpa [#allocation3 + $0x1], 1 }

</bundles_post_ra>
